<compile_context>
chip_gen: v6e
topology: v6e:2x2x1
jax: 0.10.0
libtpu: 0.0.40
codegen_flags: <defaults>
</compile_context>

<pallas_src>
import jax
import jax.numpy as jnp
from jax.experimental import pallas as pl
from jax.experimental.pallas import tpu as pltpu


def _round_up(x, m):
    return (x + m - 1) // m * m


def _tpu_info():
    """Best-effort chip query.  Conservative fallbacks keep the kernel correct
    (just not maximally tuned) on unknown hardware."""
    vmem_cap = 64 << 20          # assume the small (v7x per-TC) VMEM
    num_tc = 1                   # assume a single TensorCore per chip
    try:
        vmem_cap = int(pltpu.get_tpu_info().vmem_capacity_bytes)
    except Exception:
        pass
    try:
        kind = jax.devices()[0].device_kind.lower()
        if "v7" in kind:         # v7x: 2 TensorCores per chip
            num_tc = 2
    except Exception:
        pass
    return vmem_cap, num_tc


def _pick_tile_n(d, elem_bytes, vmem_cap, max_tile_n=None):
    """Largest hidden-column tile that (a) divides D, (b) is lane aligned and
    (c) keeps the double-buffered W1 stream within a generation-aware budget:
    generous on 128 MiB parts (v5e/v6e) so tiles are big and grid steps few,
    conservative on 64 MiB v7x / unknown chips."""
    if d % 128 != 0:
        # Irregular / tiny hidden size: a single block over the hidden dim.
        return d
    budget = (72 << 20) if vmem_cap >= (96 << 20) else (24 << 20)
    tn = max(128, (budget // (2 * d * elem_bytes)) // 128 * 128)
    tn = min(tn, d)
    if max_tile_n is not None:
        tn = min(tn, max(128, max_tile_n // 128 * 128))
    while d % tn != 0:                      # terminates: 128 divides d
        tn -= 128
    return tn


def _make_kernel(tiles_per_p, tn, n_tiles):
    def kernel(pooled_ref, w1_ref, b1_ref, w2_ref, out_ref):
        """One (p, j) grid step.

        pooled_ref: [Bp, D]        pooled tokens          (resident)
        w1_ref:     [D, tn]        W1 column tile         (streamed per step)
        b1_ref:     [n_tiles, tn]  pooler bias, f32       (resident)
        w2_ref:     [D, Cp]        fc weight              (resident)
        out_ref:    [Bp, Cp]       f32 partial logits for this p; its block
                                   index is constant across j, so it stays
                                   resident and is accumulated in place.
        """
        j = pl.program_id(1)

        @pl.when(j == 0)
        def _init():
            out_ref[...] = jnp.zeros_like(out_ref)

        # pooler_layer restricted to this column tile, epilogue in f32:
        #   h_j = tanh(x @ W1[:, tile] + b1[tile])
        h = jnp.dot(pooled_ref[...], w1_ref[...],
                    preferred_element_type=jnp.float32)
        if n_tiles == 1:
            b1_tile = b1_ref[...]                                  # [1, tn]
            w2_tile = w2_ref[...]                                  # [tn, Cp]
        else:
            idx = pl.program_id(0) * tiles_per_p + j   # global hidden tile
            b1_tile = b1_ref[pl.ds(idx, 1), :]                     # [1, tn]
            row = pl.multiple_of(idx * tn, tn)
            w2_tile = w2_ref[pl.ds(row, tn), :]                    # [tn, Cp]
        h = jnp.tanh(h + b1_tile)

        # fc_layer contribution of this tile, accumulated in f32 on the MXU.
        out_ref[...] += jnp.dot(h.astype(w2_tile.dtype), w2_tile,
                                preferred_element_type=jnp.float32)

    return kernel


def seq_classification_forward(hidden_states, w1, b1, w2, b2,
                               pooler_index=0, compute_dtype=None,
                               max_tile_n=None, tile_major_w1=False,
                               use_pallas=None):
    """hidden_states: [B, S, D].
    w1: [D, D] (stored as in_dim x out_dim), b1: [D]  -- pooler Linear
    w2: [D, C],                              b2: [C]  -- fc Linear
    Returns logits [B, C] in hidden_states.dtype.

    compute_dtype: dtype of the MXU operand stream.  Defaults to bf16 when the
    model is stored in f32 (halves the dominant W1 HBM traffic); accumulation,
    bias adds and tanh are always f32.
    tile_major_w1: pre-layout W1 as [n_tiles, D, tn] so each streamed tile is
    a single contiguous DMA (do this once offline for static weights).
    """
    B, S, D = hidden_states.shape
    C = w2.shape[1]
    out_dtype = hidden_states.dtype

    if compute_dtype is None:
        compute_dtype = (jnp.bfloat16 if hidden_states.dtype == jnp.float32
                         else hidden_states.dtype)
    elem_bytes = jnp.dtype(compute_dtype).itemsize

    if use_pallas is None:
        # Tiny problems: pallas_call fixed overhead (~us) dominates and XLA
        # fusion is strictly faster; route them away from the kernel.
        use_pallas = (D % 128 == 0) and D >= 1024
    if not use_pallas:
        pooled = jnp.tanh(hidden_states[:, pooler_index, :] @ w1 + b1)
        return (pooled @ w2 + b2).astype(out_dtype)

    vmem_cap, num_tc = _tpu_info()

    # ---- glue (token select, cast, pad): tiny ops, fused by XLA -------------
    pooled = hidden_states[:, pooler_index, :].astype(compute_dtype)   # [B, D]
    sublane = 8 if elem_bytes >= 4 else 16
    Bp = _round_up(B, sublane)              # sublane-dense batch
    Cp = _round_up(C, 128)                  # lane-dense class dim
    pooled_p = jnp.pad(pooled, ((0, Bp - B), (0, 0)))
    w1_c = w1.astype(compute_dtype)                                     # [D, D]
    w2_p = jnp.pad(w2.astype(compute_dtype), ((0, 0), (0, Cp - C)))     # [D, Cp]

    # ---- tiling over the hidden (W1-column / W2-row) dimension --------------
    tn = _pick_tile_n(D, elem_bytes, vmem_cap, max_tile_n)
    n_tiles = D // tn
    # Leading axis P: split the hidden range across the 2 TensorCores of a v7x
    # chip (grid axis marked "parallel"); single-TC chips keep P=1 so there is
    # no extra partial writeback / wrapper sum.
    P = 1
    if num_tc >= 2 and n_tiles > 1:
        if n_tiles % 2 == 0:
            P = 2
        elif tn % 256 == 0:
            tn //= 2                        # keep both cores busy on odd counts
            n_tiles = D // tn
            P = 2
    tiles_per_p = n_tiles // P

    b1_t = b1.astype(jnp.float32).reshape(n_tiles, tn)   # tile-major bias

    if tile_major_w1 and n_tiles > 1:
        # Each streamed tile becomes one contiguous [D, tn] slab in HBM.
        w1_stream = w1_c.reshape(D, n_tiles, tn).transpose(1, 0, 2)
        w1_spec = pl.BlockSpec((None, D, tn),
                               lambda p, j: (p * tiles_per_p + j, 0, 0))
    else:
        w1_stream = w1_c
        w1_spec = pl.BlockSpec((D, tn), lambda p, j: (0, p * tiles_per_p + j))
    # NOTE: if the W1 DMA ever shows exposed latency on v7x, add
    # pipeline_mode=pl.Buffered(3) to w1_spec.

    # ---- explicit VMEM budget (streamed W1 is double-buffered) --------------
    vmem_need = (
        2 * D * tn * elem_bytes                    # W1 tile (x2 buffers)
        + 2 * Bp * D * elem_bytes                  # pooled (resident)
        + 2 * _round_up(n_tiles, 8) * tn * 4       # b1 (resident, f32)
        + 2 * D * Cp * elem_bytes                  # w2 (resident)
        + 2 * Bp * Cp * 4                          # output block
    )
    vmem_limit = int(min(max(vmem_need * 5 // 4 + (2 << 20), 16 << 20),
                         vmem_cap * 3 // 4))       # headroom for the compiler

    cost = pl.CostEstimate(
        flops=2 * Bp * D * D + 2 * Bp * D * Cp,
        transcendentals=Bp * D,
        bytes_accessed=(D * D + D * Cp + Bp * D) * elem_bytes
        + D * 4 + P * Bp * Cp * 4,
    )

    kernel = _make_kernel(tiles_per_p, tn, n_tiles)

    partial = pl.pallas_call(
        kernel,
        out_shape=jax.ShapeDtypeStruct((P, Bp, Cp), jnp.float32),
        grid=(P, tiles_per_p),
        in_specs=[
            pl.BlockSpec((Bp, D), lambda p, j: (0, 0)),        # pooled (res.)
            w1_spec,                                           # W1 (streamed)
            pl.BlockSpec((n_tiles, tn), lambda p, j: (0, 0)),  # b1 (resident)
            pl.BlockSpec((D, Cp), lambda p, j: (0, 0)),        # w2 (resident)
        ],
        out_specs=pl.BlockSpec((None, Bp, Cp), lambda p, j: (p, 0, 0)),
        compiler_params=pltpu.CompilerParams(
            dimension_semantics=("parallel", "arbitrary"),
            vmem_limit_bytes=vmem_limit),
        cost_estimate=cost,
    )(pooled_p, w1_stream, b1_t, w2_p)

    # Sum the per-core partials, add the fc bias, drop padding.
    logits = partial.sum(axis=0)[:B, :C] + b2.astype(jnp.float32)
    return logits.astype(out_dtype)


def _reference(hidden_states, w1, b1, w2, b2, pooler_index=0):
    pooled = hidden_states[:, pooler_index, :]
    pooled = jnp.tanh(pooled @ w1 + b1)
    return pooled @ w2 + b2


if __name__ == "__main__":
    key = jax.random.PRNGKey(0)
    (k_hs, k_w1, k_b1, k_w2, k_b2,
     k_hs2, k_w1b, k_w2b) = jax.random.split(key, 8)

    # ---- small shapes implied by the module: [B, S, D] -> [B, C] ------------
    B, S, D, C = 2, 8, 32, 4  # batch, seq, model_dim, num_classes
    hidden_states = jax.random.normal(k_hs, (B, S, D), dtype=jnp.float32)
    # Linear weights stored pre-transposed as [in_dim, out_dim].
    w1 = jax.random.normal(k_w1, (D, D), dtype=jnp.float32) / jnp.sqrt(D)
    b1 = jax.random.normal(k_b1, (D,), dtype=jnp.float32) * 0.01
    w2 = jax.random.normal(k_w2, (D, C), dtype=jnp.float32) / jnp.sqrt(D)
    b2 = jax.random.normal(k_b2, (C,), dtype=jnp.float32) * 0.01
    ref = _reference(hidden_states, w1, b1, w2, b2, pooler_index=0)

    # 1) Default path (bf16 operand stream, f32 accumulation), forced Pallas.
    out = seq_classification_forward(hidden_states, w1, b1, w2, b2,
                                     pooler_index=0, use_pallas=True)
    out = jax.block_until_ready(out)
    assert out.shape == (B, C), out.shape
    assert jnp.allclose(out, ref, atol=5e-2, rtol=5e-2), "bf16 mismatch"

    # 2) Full-f32 operand stream (tight tolerance).
    out_f32 = seq_classification_forward(hidden_states, w1, b1, w2, b2,
                                         pooler_index=0,
                                         compute_dtype=jnp.float32,
                                         use_pallas=True)
    out_f32 = jax.block_until_ready(out_f32)
    assert jnp.allclose(out_f32, ref, atol=1e-5, rtol=1e-5), "f32 mismatch"

    # 3) Auto-dispatch: a tiny problem routes to plain XLA, same numbers.
    out_xla = seq_classification_forward(hidden_states, w1, b1, w2, b2,
                                         pooler_index=0)
    assert jnp.allclose(jax.block_until_ready(out_xla), ref,
                        atol=1e-5, rtol=1e-5), "xla-dispatch mismatch"

    # 4) Larger hidden size with a forced 128-wide tile: exercises the tiled /
    #    accumulating grid, the resident-W2 dynamic slice, the tile-major W1
    #    layout and (on v7x) the 2-way TensorCore split.
    D2 = 512
    hs2 = jax.random.normal(k_hs2, (B, S, D2), dtype=jnp.float32)
    w1b = jax.random.normal(k_w1b, (D2, D2), dtype=jnp.float32) / jnp.sqrt(D2)
    b1b = jnp.zeros((D2,), jnp.float32)
    w2b = jax.random.normal(k_w2b, (D2, C), dtype=jnp.float32) / jnp.sqrt(D2)
    b2b = jnp.zeros((C,), jnp.float32)
    ref2 = _reference(hs2, w1b, b1b, w2b, b2b, pooler_index=3)

    out2 = seq_classification_forward(hs2, w1b, b1b, w2b, b2b,
                                      pooler_index=3, max_tile_n=128,
                                      compute_dtype=jnp.float32,
                                      tile_major_w1=True, use_pallas=True)
    out2 = jax.block_until_ready(out2)
    assert out2.shape == (B, C), out2.shape
    assert jnp.allclose(out2, ref2, atol=5e-3, rtol=5e-3), "tiled f32 mismatch"

    # 5) Same tiled problem with the default bf16 stream, row-major W1.
    out3 = seq_classification_forward(hs2, w1b, b1b, w2b, b2b,
                                      pooler_index=3, max_tile_n=128,
                                      use_pallas=True)
    out3 = jax.block_until_ready(out3)
    assert jnp.allclose(out3, ref2, atol=5e-2, rtol=5e-2), "tiled bf16 mismatch"

    print("KERNEL_OK")
</pallas_src>

<mosaic_0001>
module attributes {stable_mosaic.version = 11 : i64} {
  func.func @kernel(%arg0: i32, %arg1: i32, %arg2: memref<16x32xbf16, #tpu.memory_space<vmem>>, %arg3: memref<32x32xbf16, #tpu.memory_space<vmem>>, %arg4: memref<1x32xf32, #tpu.memory_space<vmem>>, %arg5: memref<32x128xbf16, #tpu.memory_space<vmem>>, %arg6: memref<1x16x128xf32, #tpu.memory_space<vmem>>) attributes {dimension_semantics = [#tpu.dimension_semantics<parallel>, #tpu.dimension_semantics<arbitrary>], iteration_bounds = array<i64: 1, 1>, scalar_prefetch = 0 : i64, scratch_operands = 0 : i64, tpu.core_type = #tpu.core_type<tc>, window_params = [{pipeline_mode = #tpu.pipeline_mode<synchronous>, transform_indices = @transform_0, window_bounds = array<i64: 16, 32>}, {transform_indices = @transform_1, window_bounds = array<i64: 32, 32>}, {pipeline_mode = #tpu.pipeline_mode<synchronous>, transform_indices = @transform_2, window_bounds = array<i64: 1, 32>}, {pipeline_mode = #tpu.pipeline_mode<synchronous>, transform_indices = @transform_3, window_bounds = array<i64: 32, 128>}, {transform_indices = @transform_4, window_bounds = array<i64: 1, 16, 128>}]} {
    %c0_i32 = arith.constant 0 : i32
    %0 = arith.cmpi eq, %arg1, %c0_i32 : i32
    %1 = arith.extui %0 : i1 to i32
    %c0_i32_0 = arith.constant 0 : i32
    %2 = arith.cmpi ne, %1, %c0_i32_0 : i32
    scf.if %2 {
      %cst_15 = arith.constant 0.000000e+00 : f32
      %19 = vector.broadcast %cst_15 : f32 to vector<16x128xf32>
      %c0_16 = arith.constant 0 : index
      %c0_17 = arith.constant 0 : index
      %c0_18 = arith.constant 0 : index
      %20 = vector.load %arg6[%c0_16, %c0_17, %c0_18] : memref<1x16x128xf32, #tpu.memory_space<vmem>>, vector<1x16x128xf32>
      %21 = vector.shape_cast %20 : vector<1x16x128xf32> to vector<16x128xf32>
      %22 = vector.shape_cast %19 : vector<16x128xf32> to vector<1x16x128xf32>
      tpu.vector_store %arg6[%c0_16, %c0_17, %c0_18], %22 {strides = array<i32>} : memref<1x16x128xf32, #tpu.memory_space<vmem>>, vector<1x16x128xf32>,
    } else {
    }
    %c0 = arith.constant 0 : index
    %c0_1 = arith.constant 0 : index
    %3 = vector.load %arg2[%c0, %c0_1] : memref<16x32xbf16, #tpu.memory_space<vmem>>, vector<16x32xbf16>
    %c0_2 = arith.constant 0 : index
    %c0_3 = arith.constant 0 : index
    %4 = vector.load %arg3[%c0_2, %c0_3] : memref<32x32xbf16, #tpu.memory_space<vmem>>, vector<32x32xbf16>
    %cst = arith.constant dense<0.000000e+00> : vector<16x32xf32>
    %5 = tpu.matmul %3, %4, %cst {dimension_numbers = #tpu.dot_dimension_numbers<[1], [0], [0], [1], [0, 0, 1, 1], [], []>} : vector<16x32xbf16>, vector<32x32xbf16>, vector<16x32xf32> -> vector<16x32xf32>
    %c0_4 = arith.constant 0 : index
    %c0_5 = arith.constant 0 : index
    %6 = vector.load %arg4[%c0_4, %c0_5] : memref<1x32xf32, #tpu.memory_space<vmem>>, vector<1x32xf32>
    %c0_6 = arith.constant 0 : index
    %c0_7 = arith.constant 0 : index
    %7 = vector.load %arg5[%c0_6, %c0_7] : memref<32x128xbf16, #tpu.memory_space<vmem>>, vector<32x128xbf16>
    %8 = vector.broadcast %6 : vector<1x32xf32> to vector<16x32xf32>
    %9 = arith.addf %5, %8 : vector<16x32xf32>
    %10 = math.tanh %9 : vector<16x32xf32>
    %c0_8 = arith.constant 0 : index
    %c0_9 = arith.constant 0 : index
    %c0_10 = arith.constant 0 : index
    %11 = vector.load %arg6[%c0_8, %c0_9, %c0_10] : memref<1x16x128xf32, #tpu.memory_space<vmem>>, vector<1x16x128xf32>
    %12 = vector.shape_cast %11 : vector<1x16x128xf32> to vector<16x128xf32>
    %13 = arith.truncf %10 : vector<16x32xf32> to vector<16x32xbf16>
    %cst_11 = arith.constant dense<0.000000e+00> : vector<16x128xf32>
    %14 = tpu.matmul %13, %7, %cst_11 {dimension_numbers = #tpu.dot_dimension_numbers<[1], [0], [0], [1], [0, 0, 1, 1], [], []>} : vector<16x32xbf16>, vector<32x128xbf16>, vector<16x128xf32> -> vector<16x128xf32>
    %15 = arith.addf %12, %14 : vector<16x128xf32>
    %c0_12 = arith.constant 0 : index
    %c0_13 = arith.constant 0 : index
    %c0_14 = arith.constant 0 : index
    %16 = vector.load %arg6[%c0_12, %c0_13, %c0_14] : memref<1x16x128xf32, #tpu.memory_space<vmem>>, vector<1x16x128xf32>
    %17 = vector.shape_cast %16 : vector<1x16x128xf32> to vector<16x128xf32>
    %18 = vector.shape_cast %15 : vector<16x128xf32> to vector<1x16x128xf32>
    tpu.vector_store %arg6[%c0_12, %c0_13, %c0_14], %18 {strides = array<i32>} : memref<1x16x128xf32, #tpu.memory_space<vmem>>, vector<1x16x128xf32>,
    return
  }
  func.func @transform_0(%arg0: i32, %arg1: i32) -> (i32, i32) {
    %c0_i32 = arith.constant 0 : i32
    %c0_i32_0 = arith.constant 0 : i32
    %c0_i32_1 = arith.constant 0 : i32
    return %c0_i32, %c0_i32_0 : i32, i32
  }
  func.func @transform_1(%arg0: i32, %arg1: i32) -> (i32, i32) {
    %c1_i32 = arith.constant 1 : i32
    %0 = arith.muli %arg0, %c1_i32 : i32
    %1 = arith.addi %0, %arg1 : i32
    %c0_i32 = arith.constant 0 : i32
    %c0_i32_0 = arith.constant 0 : i32
    return %c0_i32, %1 : i32, i32
  }
  func.func @transform_2(%arg0: i32, %arg1: i32) -> (i32, i32) {
    %c0_i32 = arith.constant 0 : i32
    %c0_i32_0 = arith.constant 0 : i32
    %c0_i32_1 = arith.constant 0 : i32
    return %c0_i32, %c0_i32_0 : i32, i32
  }
  func.func @transform_3(%arg0: i32, %arg1: i32) -> (i32, i32) {
    %c0_i32 = arith.constant 0 : i32
    %c0_i32_0 = arith.constant 0 : i32
    %c0_i32_1 = arith.constant 0 : i32
    return %c0_i32, %c0_i32_0 : i32, i32
  }
  func.func @transform_4(%arg0: i32, %arg1: i32) -> (i32, i32, i32) {
    %c0_i32 = arith.constant 0 : i32
    %c0_i32_0 = arith.constant 0 : i32
    %c0_i32_1 = arith.constant 0 : i32
    return %arg0, %c0_i32, %c0_i32_0 : i32, i32, i32
  }
}

</mosaic_0001>

<bundles_post_ra>
// kernel: tpu_custom_call.1
= control target key start
LH: loop header
LB: loop body
LE: loop exit
PB: predicated region body
PF: predicated region fallthrough
CT: control target
= control target key end

     0   :  { %9 = vsyncpa [#allocation3], 0  ;;  %s419_s0 = inlined_call_operand.hbm [shape: bf16[16,32], index: 0, kind: input, shape index: {}]   ;;  %s420_s1 = inlined_call_operand.hbm [shape: bf16[32,32], index: 1, kind: input, shape index: {}]   ;;  %s421_s2 = inlined_call_operand.vmem [shape: f32[1,32], index: 2, kind: input, shape index: {}]   ;;  %s422_s3 = inlined_call_operand.hbm [shape: bf16[32,128], index: 3, kind: input, shape index: {}]   ;;  %s423_s4 = inlined_call_operand.hbm [shape: f32[1,16,128], index: 4, kind: output, shape index: {}]  }
   0x1   :  { %10 = vsyncpa [#allocation6], 0 }
   0x2   :  { %11 = vsyncpa [#allocation4], 0  ;;  %s367_s15 = smov [#allocation5]   ;;  %s368_s17 = smov [#allocation2]  }
   0x3   :  { %s32_s16 = sshll.u32 %s367_s15, 4  ;;  %s17_s18 = sshll.u32 %s368_s17, 4  ;;  %s33_s16 = int_to_ptr.vmem [resolvable:$true] %s32_s16  ;;  %s18_s18 = int_to_ptr.vmem [resolvable:$true] %s17_s18 }
   0x4   :  { %s289_s19 = scalar_lea.vmem %s33_s16, 256  ;;  %p294_p1 = scmp.lt.s32.totalorder %s33_s16, %s33_s16 }
   0x5   :  { %p290_p0 = scmp.ne.s32.totalorder %s33_s16, %s289_s19  ;;  %p295_p2 = scmp.lt.s32.totalorder %s289_s19, %s289_s19 }
   0x7   :  { %p296_p3 = por %p295_p2, %p294_p1 }
   0x9   :  { %p297_p4 = pnand %p296_p3, %p290_p0 }
   0xb   :  { %300 = shalt.err (!%p297_p4)
}
   0xc   :  { %s369_s20 = smov 64   ;;  %s370_s21 = smov 4  }
   0xd   :  { %38 = dma.hbm_to_vmem [thread:$0]  %s420_s1, 256, %s33_s16, [#allocation6], %s369_s20, %s369_s20, %s370_s21  }
   0xe   :  { %s309_s24 = scalar_lea.vmem %s18_s18, 128  ;;  %p314_p6 = scmp.lt.s32.totalorder %s18_s18, %s18_s18 }
   0xf   :  { %p310_p5 = scmp.ne.s32.totalorder %s18_s18, %s309_s24  ;;  %p315_p7 = scmp.lt.s32.totalorder %s309_s24, %s309_s24 }
  0x11   :  { %p316_p8 = por %p315_p7, %p314_p6 }
  0x13   :  { %p317_p9 = pnand %p316_p8, %p310_p5 }
  0x15   :  { %320 = shalt.err (!%p317_p9)
}
  0x16   :  { %23 = dma.hbm_to_vmem [thread:$0]  %s419_s0, 128, %s18_s18, [#allocation3], %s369_s20, %s369_s20, %s370_s21  }
  0x17   :  { %s371_s27 = smov [#allocation7]  }
  0x18   :  { %s46_s28 = sshll.u32 %s371_s27, 4  ;;  %s47_s28 = int_to_ptr.vmem [resolvable:$true] %s46_s28 }
  0x19   :  { %s329_s29 = scalar_lea.vmem %s47_s28, 256  ;;  %p334_p11 = scmp.lt.s32.totalorder %s47_s28, %s47_s28 }
  0x1a   :  { %p330_p10 = scmp.ne.s32.totalorder %s47_s28, %s329_s29  ;;  %p335_p12 = scmp.lt.s32.totalorder %s329_s29, %s329_s29 }
  0x1c   :  { %p336_p13 = por %p335_p12, %p334_p11 }
  0x1e   :  { %p337_p0 = pnand %p336_p13, %p330_p10 }
  0x20   :  { %340 = shalt.err (!%p337_p0)
}
  0x21   :  { %52 = dma.hbm_to_vmem [thread:$0]  %s422_s3, 256, %s47_s28, [#allocation6], %s369_s20, %s369_s20, %s370_s21  }
  0x22   :  { %361 = dma.done.wait [#allocation3], 128  }
  0x23   :  { %362 = vsyncadd [#allocation3], 4294967168 }
  0x24   :  { %363 = dma.done.wait [#allocation6], 512  }
  0x25   :  { %364 = vsyncadd [#allocation6], 4294966784  ;;  %v372_v0 = vmov 0.0   ;;  %vm373_vm0 = vmmov 0   ;;  %v272_v1 = vld [vmem:[#allocation5 + $0x8] sm:$0xff]   ;;  %v273_v2 = vld [vmem:[#allocation5] sm:$0xff]  }
  0x26   :  { %246 = vmatprep.subr.bf16.mxu0 %v372_v0  ;;  %250 = vmatprep.mubr.msk.bf16.mxu0 %vm373_vm0, %v372_v0  ;;  %v274_v3 = vld [vmem:[#allocation2] sm:$0xff]   ;;  %vm104_vm1 = vcmask 261120   ;;  %v276_v5 = vld [vmem:[#allocation7] sm:$0xff]   ;;  %s374_s5 = smov [#allocation8]  }
  0x27   :  { %254 = vmatprep.subr.bf16.mxu1 %v372_v0  ;;  %258 = vmatprep.mubr.msk.bf16.mxu1 %vm373_vm0, %v372_v0  ;;  %v275_v4 = vld [vmem:[#allocation7 + $0x8] sm:$0xff]   ;;  %s219_s6 = sshll.u32 %s374_s5, 4  ;;  %s220_s6 = int_to_ptr.vmem [resolvable:$true] %s219_s6 }
  0x28   :  { %247 = vmatpush3.bf16.msra.mxu0 %v272_v1  ;;  %255 = vmatpush3.bf16.msra.mxu1 %v275_v4  ;;  %v232_v6 = vld [vmem:[%s421_s2] ss:$0 sm:$0xff]  ;;  %s341_s2 = scalar_lea.vmem %s220_s6, 256  ;;  %p346_p2 = scmp.lt.s32.totalorder %s220_s6, %s220_s6 }
  0x29   :  { %248 = vmatprep.subr.bf16.mxu0 %v372_v0  ;;  %256 = vmatprep.subr.bf16.mxu1 %v372_v0  ;;  %p342_p1 = scmp.ne.s32.totalorder %s220_s6, %s341_s2  ;;  %p347_p3 = scmp.lt.s32.totalorder %s341_s2, %s341_s2 }
  0x2b   :  { %p348_p4 = por %p347_p3, %p346_p2 }
  0x2c   :  { %249 = vmatpush3.bf16.msra.mxu0 %v273_v2  ;;  %257 = vmatpush3.bf16.msra.mxu1 %v276_v5 }
  0x2d   :  { %p349_p5 = pnand %p348_p4, %p342_p1 }
  0x2f   :  { %251 = vmatmul.mubr.msk.bf16.vlgmr.msra.gmra.mxu0 %vm104_vm1, %v274_v3 }
  0xef   :  { %v142_v7 = vpop.f32.mrf.mxu0 }
  0xf0   :  { %v143_v8 = vadd.f32 %v232_v6, %v142_v7 }
  0xf1   :  { %v252_v9 = vpop.f32.mrf.mxu0 }
  0xf2   :  { %277 = vtanh.f32 %v143_v8 }
  0xf3   :  { %v145_v10 = vpop.f32.mrf.mxu0 }
  0xf4   :  { %v146_v11 = vadd.f32 %v232_v6, %v145_v10 }
  0xf5   :  { %v253_v12 = vpop.f32.mrf.mxu0 }
  0xf6   :  { %279 = vtanh.f32 %v146_v11 }
  0xff   :  { %v278_v13 = vpop.eup %277 }
 0x103   :  { %v280_v14 = vpop.eup %279 }
 0x104   :  { %v153_v15 = vpack.c.bf16 %v280_v14, %v278_v13 }
 0x106   :  { %259 = vmatmul.mubr.msk.bf16.vlgmr.msra.gmra.mxu1 %vm104_vm1, %v153_v15 }
 0x1c6   :  { %v203_v16 = vpop.f32.mrf.mxu1 }
 0x1c7   :  { %212 = vst [vmem:[#allocation8] sm:$0xff] %v203_v16 }
 0x1c8   :  { %v260_v17 = vpop.f32.mrf.mxu1 }
 0x1ca   :  { %v206_v18 = vpop.f32.mrf.mxu1 }
 0x1cb   :  { %213 = vst [vmem:[#allocation8 + $0x8] sm:$0xff] %v206_v18 }
 0x1cc   :  { %v261_v19 = vpop.f32.mrf.mxu1 }
 0x1cd   :  { %352 = shalt.err (!%p349_p5)
}
 0x1ce   :  { %s375_s7 = smov 128   ;;  %s376_s8 = smov 8  }
 0x1cf   :  { %225 = dma.vmem_to_hbm [thread:$0]  %s220_s6, 256, %s423_s4, [#allocation4], %s375_s7, %s375_s7, %s376_s8  }
 0x1d0   :  { %365 = dma.done.wait [#allocation4], 256  }
 0x1d1   :  { %366 = vsyncadd [#allocation4], 4294967040 }
 0x1d2   :  { %229 = vsyncpa [#allocation3], 1 }
 0x1d3   :  { %230 = vsyncpa [#allocation6], 1 }
 0x1d4   :  { %231 = vsyncpa [#allocation4], 1 }

</bundles_post_ra>
